<compile_context>
chip_gen: v7x
topology: tpu7x:2x2x1
jax: 0.10.0
libtpu: 0.0.40
codegen_flags: <defaults>
</compile_context>

<pallas_src>
import functools

import jax
import jax.numpy as jnp
from jax.experimental import pallas as pl
from jax.experimental.pallas import tpu as pltpu


def time2vec_kernel(tau_ref, w_ref, b_ref, o_ref, *, out_features):
    lanes = o_ref.shape[-1]
    # z = tau_folded @ blockdiag([w|w0]) + tiled([b|b0])  -> (tm, lanes)
    z = jnp.dot(tau_ref[...], w_ref[...], preferred_element_type=jnp.float32)
    z = z + b_ref[...]                      # (1, lanes) broadcasts over rows

    # Lane mask built on a (1, lanes) slab (2 vregs) instead of per element;
    # within each out_features-wide group the last lane is the linear (w0/b0)
    # feature, all others are periodic (sin).
    lane = jax.lax.broadcasted_iota(jnp.int32, (1, lanes), 1)
    lane_in_group = lane % out_features                      # (1, lanes) i32
    is_linear = jnp.broadcast_to(lane_in_group, z.shape) == (out_features - 1)

    o_ref[...] = jnp.where(is_linear, z, jnp.sin(z)).astype(o_ref.dtype)


@functools.partial(jax.jit, static_argnames=("out_features", "out_dtype"))
def time2vec(tau, w, b, w0, b0, *, out_features, out_dtype=None):
    out_dtype = tau.dtype if out_dtype is None else out_dtype

    # ---- parameter fusion (tiny, done once in the wrapper) ------------------
    w_full = jnp.concatenate([w, w0], axis=-1)          # (in, out)
    b_full = jnp.concatenate([b, b0], axis=-1)          # (out,)

    lead_shape = tau.shape[:-1]
    in_features = tau.shape[-1]
    tau2d = tau.reshape(-1, in_features)
    m = tau2d.shape[0]

    # ---- lane-dense row fold -------------------------------------------------
    if 128 % out_features == 0:
        fold = 128 // out_features
        # Densify the narrow tau tile: push fold towards 8-16 (lanes <= 512)
        # to cut lane-padding waste while keeping large MXU slack.
        while fold < 8 and fold * out_features * 2 <= 512:
            fold *= 2
    else:
        # Output block no longer lane-dense (masked stores); still correct.
        fold = 1

    pad_rows = (-m) % fold
    # TODO(synk): for ragged M the pad below and the final [:m] slice each copy
    # roughly the whole tensor in XLA; arrange m % fold == 0 upstream or add a
    # tiny tail path if that matters.
    if pad_rows:
        tau2d = jnp.pad(tau2d, ((0, pad_rows), (0, 0)))
    m_padded = m + pad_rows
    m_folded = m_padded // fold
    k_folded = fold * in_features                        # MXU K
    lanes = fold * out_features                          # MXU N / lane width

    # Block-diagonal weight (k_folded, lanes) and tiled bias (1, lanes).
    w_bd = jnp.kron(jnp.eye(fold, dtype=w_full.dtype), w_full)
    b_bd = jnp.tile(b_full, fold)[None, :]

    tau_folded = tau2d.reshape(m_folded, k_folded)       # free row-major reshape

    # ---- tile / grid selection (real, lane-padded VMEM accounting) ----------
    SUBLANE = 8
    k_pad = -(-k_folded // 128) * 128                    # tau tile lane-padded
    lanes_pad = -(-lanes // 128) * 128
    out_bytes = jnp.dtype(out_dtype).itemsize
    row_bytes = k_pad * 4 + lanes_pad * out_bytes        # per folded row, in+out
    budget = 10 * 1024 * 1024                            # double-buffered in+out
    max_tm = max(SUBLANE, (budget // (2 * row_bytes)) // SUBLANE * SUBLANE)

    if m_folded <= min(1024, max_tm):
        tm = m_folded                                    # tiny: single block
    else:
        target_steps = 8                                 # pipelining + both v7x TCs
        tm = max(-(-m_folded // target_steps), 512)      # keep per-step DMA meaningful
        tm = min(-(-tm // SUBLANE) * SUBLANE, max_tm)
    grid = (pl.cdiv(m_folded, tm),)

    # Explicit scoped-VMEM limit from the real tile footprint (+ headroom).
    w_rows_pad = -(-k_folded // SUBLANE) * SUBLANE
    tile_bytes = (2 * tm * k_pad * 4 + 2 * tm * lanes_pad * out_bytes
                  + 2 * w_rows_pad * lanes_pad * 4 + 2 * SUBLANE * lanes_pad * 4)
    vmem_limit = int(min(max(2 * tile_bytes, 16 * 1024 * 1024), 64 * 1024 * 1024))

    cost = pl.CostEstimate(
        flops=2 * m_folded * k_folded * lanes,
        transcendentals=m_folded * lanes,
        bytes_accessed=(m_folded * k_folded * 4 + k_folded * lanes * 4
                        + lanes * 4 + m_folded * lanes * out_bytes),
    )

    kernel = functools.partial(time2vec_kernel, out_features=out_features)

    out_folded = pl.pallas_call(
        kernel,
        out_shape=jax.ShapeDtypeStruct((m_folded, lanes), out_dtype),
        grid_spec=pltpu.PrefetchScalarGridSpec(
            num_scalar_prefetch=0,
            grid=grid,
            in_specs=[
                pl.BlockSpec((tm, k_folded), lambda i: (i, 0)),
                # weight / bias: constant index_map -> resident, no re-DMA
                pl.BlockSpec((k_folded, lanes), lambda i: (0, 0)),
                pl.BlockSpec((1, lanes), lambda i: (0, 0)),
            ],
            out_specs=pl.BlockSpec((tm, lanes), lambda i: (i, 0)),
        ),
        compiler_params=pltpu.CompilerParams(
            dimension_semantics=("parallel",),
            vmem_limit_bytes=vmem_limit),
        cost_estimate=cost,
    )(tau_folded, w_bd, b_bd)

    # Unfold: (m_folded, fold*out) is row-major identical to (m_padded, out).
    out2d = out_folded.reshape(m_padded, out_features)
    if pad_rows:
        out2d = out2d[:m]
    return out2d.reshape(*lead_shape, out_features)


def time2vec_ref(tau, w, b, w0, b0):
    v1 = jnp.sin(jnp.matmul(tau, w) + b)
    v2 = jnp.matmul(tau, w0) + b0
    return jnp.concatenate([v1, v2], axis=-1)


if __name__ == "__main__":
    in_features = 4
    out_features = 32
    batch, seq = 2, 8

    key = jax.random.PRNGKey(0)
    k_tau, k_w, k_b, k_w0, k_b0 = jax.random.split(key, 5)

    # Deterministic "randn"-style parameter init (same shapes as nn.Module).
    tau = jax.random.normal(k_tau, (batch, seq, in_features), dtype=jnp.float32)
    w = jax.random.normal(k_w, (in_features, out_features - 1), dtype=jnp.float32)
    b = jax.random.normal(k_b, (out_features - 1,), dtype=jnp.float32)
    w0 = jax.random.normal(k_w0, (in_features, 1), dtype=jnp.float32)
    b0 = jax.random.normal(k_b0, (1,), dtype=jnp.float32)

    out = time2vec(tau, w, b, w0, b0, out_features=out_features)
    jax.block_until_ready(out)

    ref = time2vec_ref(tau, w, b, w0, b0)
    assert out.shape == (batch, seq, out_features), out.shape
    assert jnp.allclose(out, ref, atol=1e-5, rtol=1e-5), "mismatch vs reference"

    print("KERNEL_OK")
</pallas_src>

<mosaic_0001>
module attributes {stable_mosaic.version = 11 : i64} {
  func.func @time2vec_kernel(%arg0: i32, %arg1: memref<2x32xf32, #tpu.memory_space<vmem>>, %arg2: memref<32x256xf32, #tpu.memory_space<vmem>>, %arg3: memref<1x256xf32, #tpu.memory_space<vmem>>, %arg4: memref<2x256xf32, #tpu.memory_space<vmem>>) attributes {dimension_semantics = [#tpu.dimension_semantics<parallel>], iteration_bounds = array<i64: 1>, scalar_prefetch = 0 : i64, scratch_operands = 0 : i64, tpu.core_type = #tpu.core_type<tc>, window_params = [{transform_indices = @transform_0, window_bounds = array<i64: 2, 32>}, {pipeline_mode = #tpu.pipeline_mode<synchronous>, transform_indices = @transform_1, window_bounds = array<i64: 32, 256>}, {pipeline_mode = #tpu.pipeline_mode<synchronous>, transform_indices = @transform_2, window_bounds = array<i64: 1, 256>}, {transform_indices = @transform_3, window_bounds = array<i64: 2, 256>}]} {
    %c0 = arith.constant 0 : index
    %c0_0 = arith.constant 0 : index
    %0 = vector.load %arg1[%c0, %c0_0] : memref<2x32xf32, #tpu.memory_space<vmem>>, vector<2x32xf32>
    %c0_1 = arith.constant 0 : index
    %c0_2 = arith.constant 0 : index
    %1 = vector.load %arg2[%c0_1, %c0_2] : memref<32x256xf32, #tpu.memory_space<vmem>>, vector<32x256xf32>
    %cst = arith.constant dense<0.000000e+00> : vector<2x256xf32>
    %2 = tpu.matmul %0, %1, %cst {dimension_numbers = #tpu.dot_dimension_numbers<[1], [0], [0], [1], [0, 0, 1, 1], [], []>} : vector<2x32xf32>, vector<32x256xf32>, vector<2x256xf32> -> vector<2x256xf32>
    %c0_3 = arith.constant 0 : index
    %c0_4 = arith.constant 0 : index
    %3 = vector.load %arg3[%c0_3, %c0_4] : memref<1x256xf32, #tpu.memory_space<vmem>>, vector<1x256xf32>
    %4 = vector.broadcast %3 : vector<1x256xf32> to vector<2x256xf32>
    %5 = arith.addf %2, %4 : vector<2x256xf32>
    %6 = tpu.iota {dimensions = array<i32: 1>} : vector<1x256xi32>
    %c32_i32 = arith.constant 32 : i32
    %c0_i32 = arith.constant 0 : i32
    %7 = arith.cmpi eq, %c32_i32, %c0_i32 : i32
    %c1_i32 = arith.constant 1 : i32
    %8 = arith.select %7, %c1_i32, %c32_i32 : i32
    %9 = vector.broadcast %8 : i32 to vector<1x256xi32>
    %10 = arith.remsi %6, %9 : vector<1x256xi32>
    %c0_i32_5 = arith.constant 0 : i32
    %11 = vector.broadcast %c0_i32_5 : i32 to vector<1x256xi32>
    %12 = arith.cmpi ne, %10, %11 : vector<1x256xi32>
    %c0_i32_6 = arith.constant 0 : i32
    %13 = vector.broadcast %c0_i32_6 : i32 to vector<1x256xi32>
    %14 = arith.cmpi slt, %10, %13 : vector<1x256xi32>
    %c0_i32_7 = arith.constant 0 : i32
    %15 = arith.cmpi slt, %8, %c0_i32_7 : i32
    %16 = vector.broadcast %15 : i1 to vector<1x256xi1>
    %17 = vector.broadcast %16 : vector<1x256xi1> to vector<1x256xi1>
    %18 = arith.xori %14, %17 : vector<1x256xi1>
    %19 = arith.andi %18, %12 : vector<1x256xi1>
    %20 = vector.broadcast %8 : i32 to vector<1x256xi32>
    %21 = arith.addi %10, %20 : vector<1x256xi32>
    %22 = arith.select %19, %21, %10 : vector<1x256xi1>, vector<1x256xi32>
    %23 = vector.shape_cast %22 : vector<1x256xi32> to vector<1x256xi32>
    %24 = vector.broadcast %23 : vector<1x256xi32> to vector<2x256xi32>
    %c31_i32 = arith.constant 31 : i32
    %25 = vector.broadcast %c31_i32 : i32 to vector<2x256xi32>
    %26 = arith.cmpi eq, %24, %25 : vector<2x256xi32>
    %27 = math.sin %5 : vector<2x256xf32>
    %28 = arith.select %26, %5, %27 : vector<2x256xi1>, vector<2x256xf32>
    %c0_8 = arith.constant 0 : index
    %c0_9 = arith.constant 0 : index
    %29 = vector.load %arg4[%c0_8, %c0_9] : memref<2x256xf32, #tpu.memory_space<vmem>>, vector<2x256xf32>
    tpu.vector_store %arg4[%c0_8, %c0_9], %28 {strides = array<i32>} : memref<2x256xf32, #tpu.memory_space<vmem>>, vector<2x256xf32>,
    return
  }
  func.func @transform_0(%arg0: i32) -> (i32, i32) {
    %c0_i32 = arith.constant 0 : i32
    %c0_i32_0 = arith.constant 0 : i32
    return %arg0, %c0_i32 : i32, i32
  }
  func.func @transform_1(%arg0: i32) -> (i32, i32) {
    %c0_i32 = arith.constant 0 : i32
    %c0_i32_0 = arith.constant 0 : i32
    %c0_i32_1 = arith.constant 0 : i32
    return %c0_i32, %c0_i32_0 : i32, i32
  }
  func.func @transform_2(%arg0: i32) -> (i32, i32) {
    %c0_i32 = arith.constant 0 : i32
    %c0_i32_0 = arith.constant 0 : i32
    %c0_i32_1 = arith.constant 0 : i32
    return %c0_i32, %c0_i32_0 : i32, i32
  }
  func.func @transform_3(%arg0: i32) -> (i32, i32) {
    %c0_i32 = arith.constant 0 : i32
    %c0_i32_0 = arith.constant 0 : i32
    return %arg0, %c0_i32 : i32, i32
  }
}

</mosaic_0001>

<bundles_post_ra>
// kernel: tile.8
= control target key start
LH: loop header
LB: loop body
LE: loop exit
PB: predicated region body
PF: predicated region fallthrough
CT: control target
= control target key end

     0   :  { %s22_s0 = inlined_call_operand.vmem [shape: f32[32], index: 0, kind: input, shape index: {}]   ;;  %s23_s1 = inlined_call_operand.vmem [shape: f32[8,32], index: 1, kind: output, shape index: {}]  }
   0x1   :  { %v4_v0 = vld [vmem:[%s22_s0] ss:$0 sm:$0xff] }
   0x2   :  { %5 = vst [vmem:[%s23_s1] sm:$0xff] %v4_v0 }

// kernel: tile.9
= control target key start
LH: loop header
LB: loop body
LE: loop exit
PB: predicated region body
PF: predicated region fallthrough
CT: control target
= control target key end

     0   :  { %s7_s6 = smov 3  ;;  %s14_s9 = smov 3  ;;  %vm4_vm0 = vcmask 261120   ;;  %vm11_vm1 = vcmask 1048320   ;;  %vm18_vm2 = vcmask 785920   ;;  %vm25_vm3 = vcmask 523520   ;;  %s76_s0 = inlined_call_operand.vmem [shape: f32[8,32], index: 0, kind: input, shape index: {}]   ;;  %s77_s1 = inlined_call_operand.vmem [shape: f32[1,256], index: 1, kind: output, shape index: {}]  }
   0x1   :  { %v38_v0 = vld [vmem:[%s76_s0 + $0x3] ss:$4 sm:%s7_s6]   ;;  %s45_s10 = smov 96   ;;  %s21_s11 = smov 3  ;;  %v39_v1 = vld [vmem:[%s76_s0 + $0x2] ss:$4 sm:%s14_s9]  }
   0x2   :  { %9 = vrot.lane.b32.xlu0 %v38_v0, %s45_s10  ;;  %v40_v2 = vld [vmem:[%s76_s0 + $0x1] ss:$4 sm:%s21_s11]   ;;  %s2_s16 = smov 3  ;;  %s46_s17 = smov 32  }
   0x3   :  { %23 = vrot.lane.b32.xlu1 %v40_v2, %s46_s17  ;;  %v3_v3 = vld [vmem:[%s76_s0] ss:$4 sm:%s2_s16]   ;;  %s47_s0 = smov 64  }
   0x4   :  { %5 = vst.msk [vmem:[#allocation0] ss:$8 sm:$0x3] %vm4_vm0, %v3_v3  }
   0x6   :  { %16 = vrot.lane.b32.xlu0 %v39_v1, %s47_s0 }
  0x74   :  { %v10_v4 = vpop.permute.xlu0 %9  }
  0x75   :  { %12 = vst.msk [vmem:[#allocation0] ss:$8 sm:$0x3] %vm11_vm1, %v10_v4   ;;  %v24_v5 = vpop.permute.xlu1 %23  }
  0x78   :  { %v17_v6 = vpop.permute.xlu0 %16  }
  0x79   :  { %19 = vst.msk [vmem:[#allocation0] ss:$8 sm:$0x3] %vm18_vm2, %v17_v6  }
  0x7a   :  { %26 = vst.msk [vmem:[#allocation0] ss:$8 sm:$0x3] %vm25_vm3, %v24_v5  }
  0x81   :  { %v30_v7 = vld [vmem:[#allocation0] sm:$0x1]  ;;  %v34_v8 = vld [vmem:[#allocation0 + $0x8] sm:$0x1] }
  0x82   :  { %32 = vst [vmem:[%s77_s1] sm:$0x1] %v30_v7  ;;  %41 = vst [vmem:[%s77_s1 + $0x1] sm:$0x1] %v34_v8 }

// kernel: time2vec.1
= control target key start
LH: loop header
LB: loop body
LE: loop exit
PB: predicated region body
PF: predicated region fallthrough
CT: control target
= control target key end

     0   :  { %v406_v3 = vmov 0.0   ;;  %vm35_vm0 = vcmask 261120   ;;  %v25_v14 = vlaneseq  ;;  %v407_v45 = vmov 683565275   ;;  %s532_s1 = inlined_call_operand.vmem [shape: f32[32,256], index: 1, kind: input, shape index: {}]   ;;  %s533_s0 = inlined_call_operand.vmem [shape: f32[2,32], index: 0, kind: input, shape index: {}]   ;;  %s534_s2 = inlined_call_operand.vmem [shape: f32[1,256], index: 2, kind: input, shape index: {}]   ;;  %s535_s3 = inlined_call_operand.vmem [shape: f32[2,256], index: 3, kind: output, shape index: {}]  }
   0x1   :  { %v16_v0 = vld [vmem:[%s532_s1 + $0x8] sm:$0xff]  ;;  %v18_v1 = vld [vmem:[%s532_s1 + $0x18] sm:$0xff]  ;;  %v15_v2 = vld [vmem:[%s532_s1] sm:$0xff]  ;;  %103 = vmatprep.mubr.f32.mxu0 %v406_v3  ;;  %v408_v49 = vmov 2475754826  }
   0x2   :  { %v375_v4 = vpack.c.bf16 %v18_v1, %v16_v0  ;;  %v17_v5 = vld [vmem:[%s532_s1 + $0x10] sm:$0xff]  ;;  %v20_v6 = vld [vmem:[%s532_s1 + $0x28] sm:$0xff]  ;;  %v22_v7 = vld [vmem:[%s532_s1 + $0x38] sm:$0xff]  ;;  %v26_v15 = vshrl.u32 %v25_v14, 7  ;;  %v409_v51 = vmov 2131351028  }
   0x3   :  { %v377_v8 = vpack.c.bf16 %v17_v5, %v15_v2  ;;  %v379_v9 = vpack.c.bf16 %v22_v7, %v20_v6  ;;  %v19_v10 = vld [vmem:[%s532_s1 + $0x20] sm:$0xff]  ;;  %v21_v11 = vld [vmem:[%s532_s1 + $0x30] sm:$0xff]  ;;  %v410_v53 = vmov 2102212464   ;;  %v411_v55 = vmov 920167782  }
   0x4   :  { %376 = vmatprep.subr.bf16.mxu0 %v375_v4  ;;  %v381_v12 = vpack.c.bf16 %v21_v11, %v19_v10  ;;  %v14_v13 = vld [vmem:[%s533_s0] sm:$0x3]  ;;  %v27_v16 = vsub.s32 0, %v26_v15  ;;  %v31_v18 = vsub.s32 1, %v26_v15  ;;  %v412_v62 = vmov 1326507024  }
   0x5   :  { %378 = vmatpush1.bf16.msra.mxu0 %v377_v8  ;;  %v23_v17 = vld [vmem:[%s534_s2] sm:$0x3] }
   0x6   :  { %380 = vmatprep.subr.bf16.mxu0 %v379_v9  ;;  %v28_v19 = vrot.slane %v23_v17, %v27_v16  ;;  %v32_v20 = vrot.slane %v23_v17, %v31_v18 }
   0x9   :  { %382 = vmatpush1.bf16.msra.mxu0 %v381_v12 }
   0xc   :  { %365 = vmatmul.mubr.msk.f32.vlgmr.msra.gmra.mrb[0].mxu0 %vm35_vm0, %v14_v13 }
  0xdf   :  { %v105_v21 = vpop.f32.mrb[0].mxu0 }
  0xe0   :  { %v464_v22 = vadd.f32 %v105_v21, %v28_v19  ;;  %v107_v23 = vpop.f32.mrb[1].mxu0 }
  0xe1   :  { %v466_v24 = vadd.f32 %v107_v23, %v32_v20 }
  0xe2   :  { %v139_v25 = vand.u32 2147483647, %v464_v22  ;;  %v142_v26 = vand.u32 2139095040, %v464_v22  ;;  %vm141_vm15 = vcmp.lt.s32.totalorder %v464_v22, 0 }
  0xe3   :  { %v246_v27 = vand.u32 2139095040, %v466_v24  ;;  %v243_v30 = vand.u32 2147483647, %v466_v24 }
  0xe4   :  { %v143_v28 = vshrl.u32 %v142_v26, 23  ;;  %v146_v29 = vand.u32 8388607, %v139_v25  ;;  %vm140_vm0 = vcmp.le.f32.partialorder %v139_v25, 0.7853982 }
  0xe5   :  { %v247_v31 = vshrl.u32 %v246_v27, 23  ;;  %v476_v36 = vand.u32 8388607, %v243_v30 }
  0xe6   :  { %v366_v32 = vadd.s32 4294967169, %v143_v28  ;;  %v147_v35 = vor.u32 8388608, %v146_v29 }
  0xe7   :  { %v370_v33 = vadd.s32 4294967169, %v247_v31  ;;  %v251_v43 = vor.u32 8388608, %v476_v36 }
  0xe8   :  { %v149_v34 = vadd.s32 1, %v366_v32  ;;  %v478_v42 = vshll.u32 %v147_v35, 8 }
  0xe9   :  { %v253_v37 = vadd.s32 1, %v370_v33 }
  0xea   :  { %vm150_vm1 = vcmp.gt.s32.totalorder %v149_v34, 0 }
  0xeb   :  { %v151_v38 = vsel %vm150_vm1, %v149_v34, 0  ;;  %vm254_vm2 = vcmp.gt.s32.totalorder %v253_v37, 0  ;;  %vm245_vm1 = vcmp.lt.s32.totalorder %v466_v24, 0 }
  0xec   :  { %v152_v39 = vshrl.u32 %v151_v38, 5  ;;  %v153_v40 = vand.u32 31, %v151_v38  ;;  %v255_v41 = vsel %vm254_vm2, %v253_v37, 0  ;;  %v291_v38 = vshll.u32 %v251_v43, 8 }
  0xed   :  { %v481_v47 = vshrl.u32 %v255_v41, 5  ;;  %v257_v48 = vand.u32 31, %v255_v41  ;;  %vm244_vm2 = vcmp.le.f32.partialorder %v243_v30, 0.7853982 }
  0xee   :  { %v154_v44 = vsub.s32 32, %v153_v40  ;;  %v156_v46 = vshll.u32 %v407_v45, %v153_v40  ;;  %v159_v50 = vshll.u32 %v408_v49, %v153_v40  ;;  %v162_v52 = vshll.u32 %v409_v51, %v153_v40 }
  0xef   :  { %v165_v54 = vshll.u32 %v410_v53, %v153_v40  ;;  %v168_v56 = vshll.u32 %v411_v55, %v153_v40  ;;  %vm171_vm3 = vcmp.lt.s32.totalorder %v152_v39, 1  ;;  %vm172_vm4 = vcmp.lt.s32.totalorder %v152_v39, 2 }
  0xf0   :  { %v157_v57 = vshrl.u32 %v408_v49, %v154_v44  ;;  %v160_v58 = vshrl.u32 %v409_v51, %v154_v44  ;;  %v163_v59 = vshrl.u32 %v410_v53, %v154_v44  ;;  %v155_v60 = vshrl.u32 %v407_v45, %v154_v44 }
  0xf1   :  { %v166_v61 = vshrl.u32 %v411_v55, %v154_v44  ;;  %v169_v63 = vshrl.u32 %v412_v62, %v154_v44  ;;  %v258_v3 = vsub.s32 32, %v257_v48  ;;  %vm173_vm5 = vcmp.lt.s32.totalorder %v152_v39, 3 }
  0xf2   :  { %v158_v0 = vor.u32 %v157_v57, %v156_v46  ;;  %v161_v1 = vor.u32 %v160_v58, %v159_v50  ;;  %v164_v2 = vor.u32 %v163_v59, %v162_v52  ;;  %vm174_vm6 = vcmp.lt.s32.totalorder %v152_v39, 4 }
  0xf3   :  { %v167_v4 = vor.u32 %v166_v61, %v165_v54  ;;  %v170_v5 = vor.u32 %v169_v63, %v168_v56  ;;  %v260_v13 = vshll.u32 %v407_v45, %v257_v48  ;;  %v261_v17 = vshrl.u32 %v408_v49, %v258_v3 }
  0xf4   :  { %v175_v6 = vsel %vm171_vm3, %v155_v60, %v158_v0  ;;  %v176_v7 = vsel %vm174_vm6, %v164_v2, 2102212464  ;;  %v179_v8 = vsel %vm171_vm3, %v158_v0, %v161_v1  ;;  %v183_v9 = vsel %vm171_vm3, %v161_v1, %v164_v2 }
  0xf5   :  { %v177_v10 = vsel %vm173_vm5, %v161_v1, %v176_v7  ;;  %v180_v11 = vsel %vm174_vm6, %v167_v4, 920167782  ;;  %v184_v12 = vsel %vm174_vm6, %v170_v5, 1326507024  ;;  %v263_v18 = vshll.u32 %v408_v49, %v257_v48 }
  0xf6   :  { %v181_v15 = vsel %vm173_vm5, %v164_v2, %v180_v11  ;;  %v185_v16 = vsel %vm173_vm5, %v167_v4, %v184_v12  ;;  %v178_v19 = vsel %vm172_vm4, %v175_v6, %v177_v10  ;;  %v264_v23 = vshrl.u32 %v409_v51, %v258_v3 }
  0xf7   :  { %v182_v20 = vsel %vm172_vm4, %v179_v8, %v181_v15  ;;  %v186_v21 = vsel %vm172_vm4, %v183_v9, %v185_v16  ;;  %v262_v31 = vor.u32 %v261_v17, %v260_v13  ;;  %v266_v33 = vshll.u32 %v409_v51, %v257_v48 }
  0xf8   :  { %v490_v26 = vmul.u32.u64.low %v478_v42, %v186_v21  ;;  %v491_v27 = vmul.u32.u64.high %v478_v42, %v186_v21, %v490_v26  ;;  %v494_v28 = vmul.u32.u64.low %v478_v42, %v182_v20  ;;  %v495_v29 = vmul.u32.u64.high %v478_v42, %v182_v20, %v494_v28 }
  0xf9   :  { %v265_v32 = vor.u32 %v264_v23, %v263_v18  ;;  %v267_v34 = vshrl.u32 %v410_v53, %v258_v3  ;;  %v269_v35 = vshll.u32 %v410_v53, %v257_v48  ;;  %v270_v36 = vshrl.u32 %v411_v55, %v258_v3 }
  0xfa   :  { %v273_v37 = vshrl.u32 %v412_v62, %v258_v3  ;;  %v194_v39 = vmul.u32 %v478_v42, %v178_v19  ;;  %v259_v40 = vshrl.u32 %v407_v45, %v258_v3  ;;  %v272_v44 = vshll.u32 %v411_v55, %v257_v48 }
  0xfb   :  { %v268_v41 = vor.u32 %v267_v34, %v266_v33  ;;  %vm196_vm7 = vc.u32 %v491_v27, %v494_v28  ;;  %v197_v46 = vadd.s32 1, %v495_v29  ;;  %v271_v49 = vor.u32 %v270_v36, %v269_v35 }
  0xfc   :  { %vm275_vm8 = vcmp.lt.s32.totalorder %v481_v47, 1  ;;  %v274_v50 = vor.u32 %v273_v37, %v272_v44  ;;  %vm277_vm9 = vcmp.lt.s32.totalorder %v481_v47, 3  ;;  %vm278_vm10 = vcmp.lt.s32.totalorder %v481_v47, 4 }
  0xfd   :  { %v283_v51 = vsel %vm275_vm8, %v262_v31, %v265_v32  ;;  %v198_v43 = vsel %vm196_vm7, %v197_v46, %v495_v29  ;;  %v280_v52 = vsel %vm278_vm10, %v268_v41, 2102212464  ;;  %v284_v42 = vsel %vm278_vm10, %v271_v49, 920167782 }
  0xfe   :  { %v287_v45 = vsel %vm275_vm8, %v265_v32, %v268_v41  ;;  %v199_v53 = vadd.s32 %v198_v43, %v194_v39  ;;  %vm276_vm11 = vcmp.lt.s32.totalorder %v481_v47, 2  ;;  %v285_v48 = vsel %vm277_vm9, %v268_v41, %v284_v42 }
  0xff   :  { %v288_v54 = vsel %vm278_vm10, %v274_v50, 1326507024  ;;  %v279_v55 = vsel %vm275_vm8, %v259_v40, %v262_v31  ;;  %v281_v56 = vsel %vm277_vm9, %v265_v32, %v280_v52  ;;  %v286_v57 = vsel %vm276_vm11, %v283_v51, %v285_v48 }
 0x100   :  { %v289_v58 = vsel %vm277_vm9, %v271_v49, %v288_v54  ;;  %v200_v59 = vadd.s32 536870912, %v199_v53  ;;  %v505_v61 = vmul.u32.u64.low %v291_v38, %v286_v57  ;;  %v506_v62 = vmul.u32.u64.high %v291_v38, %v286_v57, %v505_v61 }
 0x101   :  { %v290_v60 = vsel %vm276_vm11, %v287_v45, %v289_v58  ;;  %v282_v2 = vsel %vm276_vm11, %v279_v55, %v281_v56  ;;  %v195_v19 = vadd.s32 %v494_v28, %v491_v27  ;;  %vm231_vm6 = vweird.f32 %v464_v22 }
 0x102   :  { %v508_v63 = vmul.u32.u64.low %v291_v38, %v290_v60  ;;  %v509_v0 = vmul.u32.u64.high %v291_v38, %v290_v60, %v508_v63  ;;  %v201_v1 = vshrl.u32 %v200_v59, 30  ;;  %v301_v4 = vadd.s32 1, %v506_v62 }
 0x103   :  { %v298_v47 = vmul.u32 %v291_v38, %v282_v2 }
 0x104   :  { %v202_v3 = vshll.u32 %v201_v1, 30  ;;  %vm300_vm12 = vc.u32 %v509_v0, %v505_v61  ;;  %v299_v40 = vadd.s32 %v505_v61, %v509_v0  ;;  %v225_v51 = vsub.s32 4, %v201_v1 }
 0x105   :  { %v302_v6 = vsel %vm300_vm12, %v301_v4, %v506_v62  ;;  %vm335_vm12 = vweird.f32 %v466_v24 }
 0x106   :  { %v203_v5 = vsub.s32 %v199_v53, %v202_v3  ;;  %v303_v7 = vadd.s32 %v302_v6, %v298_v47  ;;  %v226_v48 = vsel %vm141_vm15, %v225_v51, %v201_v1  ;;  %v111_v3 = vand.u32 127, %v25_v14 }
 0x107   :  { %v228_v56 = vsel %vm140_vm0, 0, %v226_v48 }
 0x108   :  { %v205_v8 = vsub.s32 0, %v203_v5  ;;  %v304_v9 = vadd.s32 536870912, %v303_v7  ;;  %v232_v60 = vadd.s32 3, %v228_v56  ;;  %v112_v6 = vadd.s32 128, %v111_v3 }
 0x10a   :  { %v367_v10 = vmin.u32 %v205_v8, %v203_v5  ;;  %v305_v11 = vshrl.u32 %v304_v9, 30  ;;  %v233_v0 = vand.u32 3, %v232_v60  ;;  %v117_v8 = vand.u32 31, %v111_v3 }
 0x10c   :  { %v207_v12 = vclz %v367_v10  ;;  %v306_v13 = vshll.u32 %v305_v11, 30  ;;  %v329_v58 = vsub.s32 4, %v305_v11  ;;  %vm235_vm3 = vcmp.eq.s32.totalorder %v233_v0, 0 }
 0x10d   :  { %vm238_vm4 = vcmp.eq.s32.totalorder %v233_v0, 2  ;;  %vm234_vm5 = vcmp.lt.s32.totalorder %v233_v0, 2  ;;  %vm137_vm7 = vcmp.eq.s32.totalorder %v117_v8, 31 }
 0x10e   :  { %v368_v15 = vadd.s32 4294967294, %v207_v12  ;;  %v307_v16 = vsub.s32 %v303_v7, %v306_v13  ;;  %v330_v61 = vsel %vm245_vm1, %v329_v58, %v305_v11  ;;  %v124_v12 = vand.u32 31, %v112_v6 }
 0x10f   :  { %v332_v1 = vsel %vm244_vm2, 0, %v330_v61 }
 0x110   :  { %vm369_vm13 = vcmp.lt.s32.totalorder %v368_v15, 0  ;;  %v309_v18 = vsub.s32 0, %v307_v16  ;;  %vm138_vm10 = vcmp.eq.s32.totalorder %v124_v12, 31 }
 0x111   :  { %v210_v17 = vsel %vm369_vm13, 0, %v368_v15 }
 0x112   :  { %v211_v20 = vsub.s32 32, %v210_v17  ;;  %v215_v21 = vsub.s32 4294967266, %v210_v17  ;;  %v371_v23 = vmin.u32 %v309_v18, %v307_v16  ;;  %v212_v26 = vshll.u32 %v203_v5, %v210_v17 }
 0x113   :  { %v336_v5 = vadd.s32 3, %v332_v1 }
 0x114   :  { %v213_v29 = vshrl.u32 %v195_v19, %v211_v20  ;;  %v216_v31 = vadd.s32 127, %v215_v21  ;;  %v311_v32 = vclz %v371_v23 }
 0x115   :  { %v337_v9 = vand.u32 3, %v336_v5 }
 0x116   :  { %v214_v33 = vor.u32 %v213_v29, %v212_v26  ;;  %v217_v34 = vshll.u32 %v216_v31, 23  ;;  %v372_v35 = vadd.s32 4294967294, %v311_v32 }
 0x117   :  { %vm342_vm8 = vcmp.eq.s32.totalorder %v337_v9, 2  ;;  %vm339_vm9 = vcmp.eq.s32.totalorder %v337_v9, 0  ;;  %vm338_vm11 = vcmp.lt.s32.totalorder %v337_v9, 2 }
 0x118   :  { %v218_v36 = vor.u32 4788187, %v217_v34  ;;  %vm373_vm14 = vcmp.lt.s32.totalorder %v372_v35, 0  ;;  %v221_v38 = vcvt.s32.f32 %v214_v33 }
 0x119   :  { %v314_v39 = vsel %vm373_vm14, 0, %v372_v35 }
 0x11a   :  { %v219_v37 = vand.u32 2147483647, %v218_v36  ;;  %v315_v41 = vsub.s32 32, %v314_v39  ;;  %v319_v44 = vsub.s32 4294967266, %v314_v39  ;;  %v316_v28 = vshll.u32 %v307_v16, %v314_v39 }
 0x11c   :  { %v222_v27 = vmul.f32 %v221_v38, %v219_v37  ;;  %v317_v46 = vshrl.u32 %v299_v40, %v315_v41  ;;  %v320_v49 = vadd.s32 127, %v319_v44 }
 0x11e   :  { %v223_v50 = vxor.u32 2147483648, %v222_v27  ;;  %v318_v43 = vor.u32 %v317_v46, %v316_v28  ;;  %v321_v52 = vshll.u32 %v320_v49, 23 }
 0x120   :  { %v224_v42 = vsel %vm141_vm15, %v223_v50, %v222_v27  ;;  %v322_v53 = vor.u32 4788187, %v321_v52  ;;  %v325_v55 = vcvt.s32.f32 %v318_v43 }
 0x121   :  { %v227_v45 = vsel %vm140_vm0, %v464_v22, %v224_v42 }
 0x122   :  { %398 = vcosq.f32 %v227_v45  ;;  %v323_v54 = vand.u32 2147483647, %v322_v53 }
 0x123   :  { %400 = vsinq.f32 %v227_v45 }
 0x124   :  { %v326_v57 = vmul.f32 %v325_v55, %v323_v54 }
 0x126   :  { %v327_v59 = vxor.u32 2147483648, %v326_v57 }
 0x128   :  { %v328_v25 = vsel %vm245_vm1, %v327_v59, %v326_v57 }
 0x129   :  { %v331_v62 = vsel %vm244_vm2, %v466_v24, %v328_v25 }
 0x12a   :  { %402 = vcosq.f32 %v331_v62 }
 0x12b   :  { %404 = vsinq.f32 %v331_v62 }
 0x12c   :  { %v399_v63 = vpop.eup %398 }
 0x12d   :  { %v401_v2 = vpop.eup %400  ;;  %v239_v4 = vxor.u32 2147483648, %v399_v63 }
 0x12e   :  { %v236_v47 = vxor.u32 2147483648, %v401_v2 }
 0x12f   :  { %v240_v30 = vsel %vm238_vm4, %v239_v4, %v401_v2 }
 0x130   :  { %v237_v7 = vsel %vm235_vm3, %v399_v63, %v236_v47 }
 0x131   :  { %v241_v10 = vsel %vm234_vm5, %v237_v7, %v240_v30 }
 0x132   :  { %v242_v14 = vsel %vm231_vm6, nan, %v241_v10 }
 0x133   :  { %v347_v19 = vsel %vm137_vm7, %v464_v22, %v242_v14 }
 0x134   :  { %v403_v11 = vpop.eup %402 }
 0x135   :  { %v405_v13 = vpop.eup %404  ;;  %v343_v15 = vxor.u32 2147483648, %v403_v11 }
 0x136   :  { %v340_v16 = vxor.u32 2147483648, %v405_v13 }
 0x137   :  { %v344_v17 = vsel %vm342_vm8, %v343_v15, %v405_v13 }
 0x138   :  { %v341_v18 = vsel %vm339_vm9, %v403_v11, %v340_v16 }
 0x139   :  { %v345_v20 = vsel %vm338_vm11, %v341_v18, %v344_v17 }
 0x13a   :  { %v346_v21 = vsel %vm335_vm12, nan, %v345_v20 }
 0x13b   :  { %v348_v23 = vsel %vm138_vm10, %v466_v24, %v346_v21 }
 0x13c   :  { %v351_v26 = vcombine.low %v347_v19, %v348_v23 }
 0x13e   :  { %374 = vst.sshfl [vmem:[%s535_s3] sm:$0x33 pattern:$0x76325410] %v351_v26 }

</bundles_post_ra>
